<compile_context>
chip_gen: v7x
topology: tpu7x:2x2x1
jax: 0.10.0
libtpu: 0.0.40
codegen_flags: <defaults>
</compile_context>

<pallas_src>
import functools

import jax
import jax.numpy as jnp
from jax.experimental import pallas as pl
from jax.experimental.pallas import tpu as pltpu


def _mixture_ln_kernel(coef_ref, w_ref, b_ref, x_ref, o_ref, w_sc, b_sc, *, eps):
    # coef_ref: (tn, R)  mixture coefficients for this token tile
    # w_ref:    (R, D)   weight.T (resident; block index constant -> DMA skipped)
    # b_ref:    (R, D)   bias.T   (resident)
    # x_ref:    (tn, D)  one batch row of the token tile (batch dim squeezed)
    # w_sc/b_sc:(tn, D)  per-token affine, built once per token tile

    # Batch is the innermost grid axis -> build the per-token affine only on
    # the first batch row of each token tile; the scratch persists across the
    # remaining batch rows (their coef/W/B DMAs are skipped: same block idx).
    @pl.when(pl.program_id(1) == 0)
    def _():
        c = coef_ref[...].astype(jnp.float32)
        w_sc[...] = jnp.dot(c, w_ref[...].astype(jnp.float32),
                            preferred_element_type=jnp.float32).astype(w_sc.dtype)
        b_sc[...] = jnp.dot(c, b_ref[...].astype(jnp.float32),
                            preferred_element_type=jnp.float32).astype(b_sc.dtype)

    x = x_ref[...]
    xf = x if x.dtype == jnp.float32 else x.astype(jnp.float32)

    # F.layer_norm over the last dim: biased variance, eps inside rsqrt.
    mean = jnp.mean(xf, axis=-1, keepdims=True)
    xc = xf - mean
    var = jnp.mean(xc * xc, axis=-1, keepdims=True)
    xn = xc * jax.lax.rsqrt(var + eps)

    # Affine FMA in the scratch dtype (f32 for f32 inputs, x.dtype otherwise).
    o_ref[...] = (xn.astype(w_sc.dtype) * w_sc[...] + b_sc[...]).astype(o_ref.dtype)


def _sublane_pack(itemsize):
    return 8 if itemsize >= 4 else (16 if itemsize == 2 else 32)


def _pick_tn(n, d, itemsize, target_bytes=2 << 20):
    """Sublane-pack-aligned token tile whose (tn, d) x-block is ~target_bytes."""
    pack = _sublane_pack(itemsize)
    row_bytes = max(1, d * itemsize)
    tn = max(pack, (target_bytes // row_bytes) // pack * pack)
    n_padded = -(-n // pack) * pack
    return int(min(tn, n_padded))


def mixture_layer_norm(x, coef, weight, bias, *, eps=1e-5, tn=None):
    """x: [B, N, D], coef: [N, R], weight/bias: [D, R] (PyTorch convention)."""
    B, N, D = x.shape
    R = coef.shape[-1]
    assert coef.shape == (N, R)
    assert weight.shape == (D, R) and bias.shape == (D, R)

    itemsize = x.dtype.itemsize
    pack = _sublane_pack(itemsize)
    if tn is None:
        tn = _pick_tn(N, D, itemsize)
    assert tn % pack == 0, f"tn={tn} must be a multiple of the sublane pack {pack}"

    # Pad the token axis so the grid divides evenly; padded rows are all-zero
    # (finite output, zero affine) and are sliced away below.
    n_tiles = pl.cdiv(N, tn)
    n_pad = n_tiles * tn
    if n_pad != N:
        x = jnp.pad(x, ((0, 0), (0, n_pad - N), (0, 0)))
        coef = jnp.pad(coef, ((0, n_pad - N), (0, 0)))

    # W.T / B.T as (R, D): lane-dense last dim, tiny and resident in VMEM.
    w_rd = jnp.transpose(weight)
    b_rd = jnp.transpose(bias)

    # Affine scratch dtype: f32 for f32 inputs; x.dtype (e.g. bf16) otherwise
    # (halves scratch VMEM + FMA lane cost on v6e/v7x; mean/var stay in f32).
    affine_dtype = jnp.float32 if x.dtype == jnp.float32 else x.dtype
    affine_itemsize = jnp.dtype(affine_dtype).itemsize

    # Explicit VMEM budget from the actual double-buffered footprint.
    blk_x = tn * D * itemsize
    blk_c = tn * R * coef.dtype.itemsize
    blk_w = R * D * weight.dtype.itemsize
    blk_sc = tn * D * affine_itemsize
    vmem_needed = (2 * 2 * blk_x        # x in + out, double-buffered
                   + 2 * blk_c          # coef, double-buffered
                   + 2 * 2 * blk_w      # W.T, B.T, double-buffered
                   + 2 * blk_sc         # affine scratch (single-buffered)
                   + (2 << 20))         # headroom
    assert vmem_needed <= (48 << 20), (
        f"tn={tn} needs ~{vmem_needed >> 20} MiB VMEM; choose a smaller tn")
    vmem_limit = int(min(max(vmem_needed, 16 << 20), 48 << 20))

    kernel = functools.partial(_mixture_ln_kernel, eps=eps)

    out = pl.pallas_call(
        kernel,
        out_shape=jax.ShapeDtypeStruct((B, n_pad, D), x.dtype),
        grid_spec=pltpu.PrefetchScalarGridSpec(
            num_scalar_prefetch=0,
            # Batch innermost: coef/W/B block indices are constant across it
            # (DMAs skipped) and the per-token affine scratch stays valid.
            grid=(n_tiles, B),
            in_specs=[
                pl.BlockSpec((tn, R), lambda n, b: (n, 0)),                    # coef
                pl.BlockSpec((R, D), lambda n, b: (0, 0)),                     # W.T
                pl.BlockSpec((R, D), lambda n, b: (0, 0)),                     # B.T
                pl.BlockSpec((pl.Squeezed(), tn, D), lambda n, b: (b, n, 0)),  # x
            ],
            out_specs=pl.BlockSpec((pl.Squeezed(), tn, D), lambda n, b: (b, n, 0)),
            scratch_shapes=[
                pltpu.VMEM((tn, D), affine_dtype),   # per-token scale
                pltpu.VMEM((tn, D), affine_dtype),   # per-token offset
            ],
        ),
        compiler_params=pltpu.CompilerParams(
            # Token axis parallel (v7x megacore splits here, preserving the
            # coef/W/B reuse); batch axis carries the scratch -> arbitrary.
            dimension_semantics=("parallel", "arbitrary"),
            vmem_limit_bytes=vmem_limit),
    )(coef, w_rd, b_rd, x)

    return out[:, :N] if n_pad != N else out


def _reference(x, coef, weight, bias, eps=1e-5):
    xf = x.astype(jnp.float32)
    mean = jnp.mean(xf, axis=-1, keepdims=True)
    xc = xf - mean
    var = jnp.mean(xc * xc, axis=-1, keepdims=True)
    xn = xc * jax.lax.rsqrt(var + eps)
    w_tok = coef.astype(jnp.float32) @ weight.astype(jnp.float32).T  # (N, D)
    b_tok = coef.astype(jnp.float32) @ bias.astype(jnp.float32).T    # (N, D)
    return (xn * w_tok[None] + b_tok[None]).astype(x.dtype)


if __name__ == "__main__":
    # Small shapes consistent with the module: D channels (lane-dense 128),
    # N tokens, R mixture rank.
    B, N, D, R = 2, 16, 128, 4
    eps = 1e-5

    key = jax.random.PRNGKey(0)
    kx, kc, kw, kb = jax.random.split(key, 4)

    x = jax.random.normal(kx, (B, N, D), dtype=jnp.float32)

    # MixtureCoefficients: per-token softmax coefficients over R experts
    # (synthesized deterministically from random logits).
    coef_logits = jax.random.normal(kc, (N, R), dtype=jnp.float32)
    coef = jax.nn.softmax(coef_logits, axis=-1)

    # reset_parameters() gives weight=ones, bias=zeros (identity affine); use
    # perturbed values so the affine path is actually exercised.
    weight = 1.0 + 0.1 * jax.random.normal(kw, (D, R), dtype=jnp.float32)
    bias = 0.1 * jax.random.normal(kb, (D, R), dtype=jnp.float32)

    out = mixture_layer_norm(x, coef, weight, bias, eps=eps)
    out = jax.block_until_ready(out)
    ref = _reference(x, coef, weight, bias, eps=eps)
    assert out.shape == (B, N, D)
    assert jnp.allclose(out, ref, atol=1e-5, rtol=1e-5), "mismatch vs reference"

    # Second case: token count not a multiple of the sublane pack exercises
    # the pad / slice-back path.
    N2 = 20
    x2 = jax.random.normal(kx, (B, N2, D), dtype=jnp.float32)
    coef2 = jax.nn.softmax(jax.random.normal(kc, (N2, R), dtype=jnp.float32), axis=-1)
    out2 = jax.block_until_ready(mixture_layer_norm(x2, coef2, weight, bias, eps=eps))
    ref2 = _reference(x2, coef2, weight, bias, eps=eps)
    assert out2.shape == (B, N2, D)
    assert jnp.allclose(out2, ref2, atol=1e-5, rtol=1e-5), "mismatch vs reference (padded)"

    print("KERNEL_OK")
</pallas_src>

<mosaic_0001>
module attributes {stable_mosaic.version = 11 : i64} {
  func.func @_mixture_ln_kernel(%arg0: i32, %arg1: i32, %arg2: memref<16x4xf32, #tpu.memory_space<vmem>>, %arg3: memref<4x128xf32, #tpu.memory_space<vmem>>, %arg4: memref<4x128xf32, #tpu.memory_space<vmem>>, %arg5: memref<1x16x128xf32, #tpu.memory_space<vmem>>, %arg6: memref<1x16x128xf32, #tpu.memory_space<vmem>>, %arg7: memref<16x128xf32, #tpu.memory_space<vmem>>, %arg8: memref<16x128xf32, #tpu.memory_space<vmem>>) attributes {dimension_semantics = [#tpu.dimension_semantics<parallel>, #tpu.dimension_semantics<arbitrary>], iteration_bounds = array<i64: 1, 2>, scalar_prefetch = 0 : i64, scratch_operands = 2 : i64, tpu.core_type = #tpu.core_type<tc>, window_params = [{transform_indices = @transform_0, window_bounds = array<i64: 16, 4>}, {pipeline_mode = #tpu.pipeline_mode<synchronous>, transform_indices = @transform_1, window_bounds = array<i64: 4, 128>}, {pipeline_mode = #tpu.pipeline_mode<synchronous>, transform_indices = @transform_2, window_bounds = array<i64: 4, 128>}, {transform_indices = @transform_3, window_bounds = array<i64: 1, 16, 128>}, {transform_indices = @transform_4, window_bounds = array<i64: 1, 16, 128>}]} {
    %c0_i32 = arith.constant 0 : i32
    %0 = arith.cmpi eq, %arg1, %c0_i32 : i32
    %1 = arith.extui %0 : i1 to i32
    %c0_i32_0 = arith.constant 0 : i32
    %2 = arith.cmpi ne, %1, %c0_i32_0 : i32
    scf.if %2 {
      %c0_14 = arith.constant 0 : index
      %c0_15 = arith.constant 0 : index
      %28 = vector.load %arg2[%c0_14, %c0_15] : memref<16x4xf32, #tpu.memory_space<vmem>>, vector<16x4xf32>
      %c0_16 = arith.constant 0 : index
      %c0_17 = arith.constant 0 : index
      %29 = vector.load %arg3[%c0_16, %c0_17] : memref<4x128xf32, #tpu.memory_space<vmem>>, vector<4x128xf32>
      %cst_18 = arith.constant dense<0.000000e+00> : vector<16x128xf32>
      %30 = tpu.matmul %28, %29, %cst_18 {dimension_numbers = #tpu.dot_dimension_numbers<[1], [0], [0], [1], [0, 0, 1, 1], [], []>} : vector<16x4xf32>, vector<4x128xf32>, vector<16x128xf32> -> vector<16x128xf32>
      %c0_19 = arith.constant 0 : index
      %c0_20 = arith.constant 0 : index
      %31 = vector.load %arg7[%c0_19, %c0_20] : memref<16x128xf32, #tpu.memory_space<vmem>>, vector<16x128xf32>
      tpu.vector_store %arg7[%c0_19, %c0_20], %30 {strides = array<i32>} : memref<16x128xf32, #tpu.memory_space<vmem>>, vector<16x128xf32>,
      %c0_21 = arith.constant 0 : index
      %c0_22 = arith.constant 0 : index
      %32 = vector.load %arg4[%c0_21, %c0_22] : memref<4x128xf32, #tpu.memory_space<vmem>>, vector<4x128xf32>
      %cst_23 = arith.constant dense<0.000000e+00> : vector<16x128xf32>
      %33 = tpu.matmul %28, %32, %cst_23 {dimension_numbers = #tpu.dot_dimension_numbers<[1], [0], [0], [1], [0, 0, 1, 1], [], []>} : vector<16x4xf32>, vector<4x128xf32>, vector<16x128xf32> -> vector<16x128xf32>
      %c0_24 = arith.constant 0 : index
      %c0_25 = arith.constant 0 : index
      %34 = vector.load %arg8[%c0_24, %c0_25] : memref<16x128xf32, #tpu.memory_space<vmem>>, vector<16x128xf32>
      tpu.vector_store %arg8[%c0_24, %c0_25], %33 {strides = array<i32>} : memref<16x128xf32, #tpu.memory_space<vmem>>, vector<16x128xf32>,
    } else {
    }
    %c0 = arith.constant 0 : index
    %c0_1 = arith.constant 0 : index
    %c0_2 = arith.constant 0 : index
    %3 = vector.load %arg5[%c0, %c0_1, %c0_2] : memref<1x16x128xf32, #tpu.memory_space<vmem>>, vector<1x16x128xf32>
    %4 = vector.shape_cast %3 : vector<1x16x128xf32> to vector<16x128xf32>
    %cst = arith.constant dense<0.000000e+00> : vector<16xf32>
    %5 = vector.multi_reduction <add>, %4, %cst [1] : vector<16x128xf32> to vector<16xf32>
    %6 = vector.shape_cast %5 : vector<16xf32> to vector<16x1xf32>
    %cst_3 = arith.constant 1.280000e+02 : f32
    %7 = vector.broadcast %cst_3 : f32 to vector<16x1xf32>
    %8 = arith.divf %6, %7 : vector<16x1xf32>
    %9 = vector.broadcast %8 : vector<16x1xf32> to vector<16x128xf32>
    %10 = arith.subf %4, %9 : vector<16x128xf32>
    %11 = arith.mulf %10, %10 : vector<16x128xf32>
    %cst_4 = arith.constant dense<0.000000e+00> : vector<16xf32>
    %12 = vector.multi_reduction <add>, %11, %cst_4 [1] : vector<16x128xf32> to vector<16xf32>
    %13 = vector.shape_cast %12 : vector<16xf32> to vector<16x1xf32>
    %cst_5 = arith.constant 1.280000e+02 : f32
    %14 = vector.broadcast %cst_5 : f32 to vector<16x1xf32>
    %15 = arith.divf %13, %14 : vector<16x1xf32>
    %cst_6 = arith.constant 9.99999974E-6 : f32
    %16 = vector.broadcast %cst_6 : f32 to vector<16x1xf32>
    %17 = arith.addf %15, %16 : vector<16x1xf32>
    %18 = math.rsqrt %17 : vector<16x1xf32>
    %19 = vector.broadcast %18 : vector<16x1xf32> to vector<16x128xf32>
    %20 = arith.mulf %10, %19 : vector<16x128xf32>
    %c0_7 = arith.constant 0 : index
    %c0_8 = arith.constant 0 : index
    %21 = vector.load %arg7[%c0_7, %c0_8] : memref<16x128xf32, #tpu.memory_space<vmem>>, vector<16x128xf32>
    %22 = arith.mulf %20, %21 : vector<16x128xf32>
    %c0_9 = arith.constant 0 : index
    %c0_10 = arith.constant 0 : index
    %23 = vector.load %arg8[%c0_9, %c0_10] : memref<16x128xf32, #tpu.memory_space<vmem>>, vector<16x128xf32>
    %24 = arith.addf %22, %23 : vector<16x128xf32>
    %c0_11 = arith.constant 0 : index
    %c0_12 = arith.constant 0 : index
    %c0_13 = arith.constant 0 : index
    %25 = vector.load %arg6[%c0_11, %c0_12, %c0_13] : memref<1x16x128xf32, #tpu.memory_space<vmem>>, vector<1x16x128xf32>
    %26 = vector.shape_cast %25 : vector<1x16x128xf32> to vector<16x128xf32>
    %27 = vector.shape_cast %24 : vector<16x128xf32> to vector<1x16x128xf32>
    tpu.vector_store %arg6[%c0_11, %c0_12, %c0_13], %27 {strides = array<i32>} : memref<1x16x128xf32, #tpu.memory_space<vmem>>, vector<1x16x128xf32>,
    return
  }
  func.func @transform_0(%arg0: i32, %arg1: i32) -> (i32, i32) {
    %c0_i32 = arith.constant 0 : i32
    %c0_i32_0 = arith.constant 0 : i32
    return %arg0, %c0_i32 : i32, i32
  }
  func.func @transform_1(%arg0: i32, %arg1: i32) -> (i32, i32) {
    %c0_i32 = arith.constant 0 : i32
    %c0_i32_0 = arith.constant 0 : i32
    %c0_i32_1 = arith.constant 0 : i32
    return %c0_i32, %c0_i32_0 : i32, i32
  }
  func.func @transform_2(%arg0: i32, %arg1: i32) -> (i32, i32) {
    %c0_i32 = arith.constant 0 : i32
    %c0_i32_0 = arith.constant 0 : i32
    %c0_i32_1 = arith.constant 0 : i32
    return %c0_i32, %c0_i32_0 : i32, i32
  }
  func.func @transform_3(%arg0: i32, %arg1: i32) -> (i32, i32, i32) {
    %c0_i32 = arith.constant 0 : i32
    %c0_i32_0 = arith.constant 0 : i32
    return %arg1, %arg0, %c0_i32 : i32, i32, i32
  }
  func.func @transform_4(%arg0: i32, %arg1: i32) -> (i32, i32, i32) {
    %c0_i32 = arith.constant 0 : i32
    %c0_i32_0 = arith.constant 0 : i32
    return %arg1, %arg0, %c0_i32 : i32, i32, i32
  }
}

</mosaic_0001>

<bundles_post_ra>
// kernel: tpu_custom_call.1
= control target key start
LH: loop header
LB: loop body
LE: loop exit
PB: predicated region body
PF: predicated region fallthrough
CT: control target
= control target key end

     0   :  { %9 = vsyncpa [#allocation5], 0  ;;  %s1040_s0 = inlined_call_operand.vmem [shape: f32[16,4], index: 0, kind: input, shape index: {}]   ;;  %s1041_s1 = inlined_call_operand.vmem [shape: f32[4,128], index: 1, kind: input, shape index: {}]   ;;  %s1042_s2 = inlined_call_operand.vmem [shape: f32[4,128], index: 2, kind: input, shape index: {}]   ;;  %s1043_s3 = inlined_call_operand.hbm [shape: f32[2,16,128], index: 3, kind: input, shape index: {}]   ;;  %s1044_s4 = inlined_call_operand.hbm [shape: f32[2,16,128], index: 4, kind: output, shape index: {}]  }
   0x1   :  { %11 = vsyncpa [#allocation5 + $0x1], 0 }
   0x2   :  { %12 = vsyncpa [#allocation6], 0 }
   0x3   :  { %14 = vsyncpa [#allocation6 + $0x1], 0  ;;  %s843_s15 = smov 0   ;;  %s845_s16 = smov 0  }
   0x4   :  { %s847_s17 = smov 0   ;;  %s849_s18 = smov 0  }
   0x5   :  { %s851_s19 = smov 0   ;;  %s853_s20 = smov 0  }
   0x6 LB: > { %s587_s21 = sadd.s32 4294967295, %s810_s20   ;;  %s588_s22 = sadd.s32 4294967294, %s810_s20   ;;  %s810_s20 = sphi %s853_s20, %s20_s20   ;;  %s806_s19 = sphi %s851_s19, %s1059_s19   ;;  %s802_s18 = sphi %s849_s18, %s1058_s18   ;;  %s798_s17 = sphi %s847_s17, %s1057_s17   ;;  %s794_s16 = sphi %s845_s16, %s1056_s16   ;;  %s790_s15 = sphi %s843_s15, %s1055_s15  }
   0x7   : > { %s29_s23 = sadd.s32 1, %s806_s19  ;;  %s109_s24 = sadd.s32 1, %s798_s17 }
   0x8   : > { %p30_p0 = scmp.ge.s32.totalorder %s29_s23, 2  ;;  %p116_p1 = scmp.ne.s32.totalorder %s798_s17, %s794_s16 }
   0x9   : > { %p117_p2 = scmp.eq.s32.totalorder %s810_s20, 0  ;;  %p122_p3 = scmp.ne.s32.totalorder %s794_s16, %s790_s15 }
   0xa   : > { %s1061_s23 = smov (%p30_p0, %s29_s23), 0  ;;  %p123_p5 = scmp.eq.s32.totalorder %s587_s21, 0 }
   0xb   : > { %p884_p4 = por %p117_p2, %p116_p1  ;;  %s104_s26 = ssub.s32 %s806_s19, %s1061_s23 }
   0xc   : > { %p148_p6 = scmp.eq.s32.totalorder %s587_s21, 1  ;;  %p107_p7 = scmp.eq.s32.totalorder %s104_s26, 0 }
   0xd   : > { %p890_p8 = por %p123_p5, %p122_p3  ;;  %p154_p10 = scmp.eq.s32.totalorder %s588_s22, 1 }
   0xe   : > { %p894_p9 = por %p148_p6, %p116_p1  ;;  %p640_p13 = scmp.lt.s32.totalorder %s810_s20, 2 }
   0xf   : > { %s899_s29 = scalar_select %p107_p7, %s798_s17, %s109_s24  }
  0x10   : > { %s1048_s28 = scalar_select %p894_p9, 1, 0 }
  0x11   : > { %p901_p11 = por %p154_p10, %p122_p3  ;;  %s189_s5 = sand.u32 1, %s798_s17  }
  0x12   : > { %s592_s6 = sshll.u32 %s189_s5, 4  ;;  %s610_s7 = sshll.u32 %s806_s19, 8 }
  0x13   : > { %s1049_s30 = scalar_select %p901_p11, 1, 0 }
  0x14   : > { %s912_s10 = scalar_lea.hbm %s1043_s3, %s610_s7  ;;  %s193_s11 = scalar_lea.vmem [#allocation4], %s592_s6 }
  0x15   : > { %s202_s12 = sshll.u32 %s193_s11, 4  ;;  %p918_p0 = pnand %p640_p13, %p884_p4  ;;  %s914_s12 = int_to_ptr.vmem [resolvable:$true] %s202_s12 }
  0x16   : > { %s923_s14 = scalar_lea.sflag [#allocation5], %s189_s5  ;;  %s698_s21 = scalar_lea.hbm %s912_s10, 256 }
  0x17   : > { %p699_p2 = scmp.ne.s32.totalorder %s912_s10, %s698_s21  ;;  %p700_p3 = pneg %p918_p0 }
  0x18   : > { %s703_s25 = scalar_lea.hbm %s1043_s3, 512  ;;  %p704_p4 = scmp.lt.u32.totalorder %s912_s10, %s1043_s3 }
  0x19   : > { %p701_p5 = pnand %p700_p3, %p699_p2  ;;  %p705_p7 = scmp.lt.u32.totalorder %s703_s25, %s698_s21 }
  0x1a   : > { %p707_p13 = scmp.lt.u32.totalorder %s698_s21, %s912_s10 }
  0x1b   : > { %p702_p6 = pneg %p701_p5  ;;  %p706_p10 = por %p705_p7, %p704_p4 }
  0x1d   : > { %p708_p12 = por %p707_p13, %p706_p10 }
  0x1f   : > { %p709_p1 = pnand %p708_p12, %p702_p6 }
  0x21   : > { %712 = shalt.err (!%p709_p1)
}
  0x22   : > { %s713_s5 = scalar_lea.vmem %s914_s12, 256  ;;  %s812_s7 = smov [#allocation4]  }
  0x23   : > { %p714_p2 = scmp.ne.s32.totalorder %s914_s12, %s713_s5  ;;  %s718_s8 = sshll.u32 %s812_s7, 4  ;;  %s719_s8 = int_to_ptr.vmem [resolvable:$false] %s718_s8 }
  0x24   : > { %s720_s9 = scalar_lea.vmem %s719_s8, 512  ;;  %p721_p9 = scmp.lt.s32.totalorder %s914_s12, %s719_s8 }
  0x25   : > { %p716_p5 = pnand %p714_p2, %p700_p3  ;;  %p722_p4 = scmp.lt.s32.totalorder %s720_s9, %s713_s5 }
  0x27   : > { %p717_p11 = pneg %p716_p5  ;;  %p723_p7 = por %p722_p4, %p721_p9 }
  0x29   : > { %p724_p10 = pnand %p723_p7, %p717_p11 }
  0x2b   : > { %727 = shalt.err (!%p724_p10)
}
  0x2c   : > { %s813_s11 = smov 128   ;;  %s814_s21 = smov 8  }
  0x2d   : > { %635 = dma.hbm_to_vmem [thread:$0]  (!%p918_p0), %s912_s10, 256, %s914_s12, %s923_s14, %s813_s11, %s813_s11, %s814_s21  }
  0x2e   : > { %p210_p12 = scmp.lt.s32.totalorder %s810_s20, 3  ;;  %p1051_p1 = scmp.ge.s32.totalorder %s810_s20, 1 }
  0x30   : > { %p211_p3 = pnand %p1051_p1, %p210_p12 }
  0x31   : > { %s955_s22 = sand.u32 (!%p211_p3), 1, %s794_s16  }
  0x32   : > { %214 = sbr.rel (%p211_p3) target bundleno = 609 (0x261), region = 36  ;;  %s596_s24 = sshll.u32 (!%p211_p3), %s955_s22, 4 }
  0x33   : > { %s217_s25 = scalar_lea.sflag (!%p211_p3), [#allocation5], %s955_s22  ;;  %s959_s26 = scalar_lea.vmem (!%p211_p3), [#allocation4], %s596_s24 }
  0x39   : > { %781 = dma.done.wait (%p890_p8), %s217_s25, 256  }
  0x3a   : > { %783 = vsyncadd (%p890_p8), %s217_s25, 4294967040  ;;  %s965_s10 = scalar_lea.vmem [#allocation7], %s596_s24  ;;  %p598_p9 = scmp.ne.s32.totalorder %s802_s18, 0 }
  0x3b   : > { %v264_v0 = vld [vmem:[%s1041_s1] sm:$0xf] (!%p598_p9)  ;;  %vm272_vm0 = vcmask (!%p598_p9), 1043456   ;;  %vm265_vm1 = vcmask (!%p598_p9), 31744   ;;  %v263_v3 = vld [vmem:[%s1040_s0 + $0x8] sm:$0xff] (!%p598_p9) }
  0x3c   : > { %261 = sbr.rel (%p598_p9) target bundleno = 278 (0x116), region = 44  ;;  %v353_v1 = vld [vmem:[%s1042_s2] sm:$0xf] (!%p598_p9)  ;;  %618 = vmatprep.subr.msk.mxu0 (!%p598_p9), %vm272_vm0, %v264_v0 }
  0x3d   : > { %v262_v2 = vld [vmem:[%s1040_s0] sm:$0xff] (!%p598_p9)  ;;  %623 = vmatprep.subr.msk.mxu1 (!%p598_p9), %vm272_vm0, %v353_v1  ;;  %619 = vmatpush3.msk.msra.mxu0 (!%p598_p9), %vm272_vm0, %v264_v0 }
  0x3e   : > { %620 = vmatprep.mubr.msk.f32.mxu0 (!%p598_p9), %vm265_vm1, %v262_v2  ;;  %624 = vmatpush3.msk.msra.mxu1 (!%p598_p9), %vm272_vm0, %v353_v1 }
  0x3f   : > { %625 = vmatprep.mubr.msk.f32.mxu1 (!%p598_p9), %vm265_vm1, %v262_v2  ;;  %621 = vmatmul.mubr.msk.f32.vlgmr.msra.gmra.mrb[0].mxu0 (!%p598_p9), %vm265_vm1, %v263_v3 }
  0x40   : > { %626 = vmatmul.mubr.msk.f32.vlgmr.msra.gmra.mrb[0].mxu1 (!%p598_p9), %vm265_vm1, %v263_v3 }
 0x112   : > { %v622_v4 = vpop.f32.mrb[0].mxu0 }
 0x113   : > { %v627_v5 = vpop.f32.mrb[0].mxu1  ;;  %352 = vst [vmem:[#allocation2 + $0x8] sm:$0xff] %v622_v4  ;;  %v342_v6 = vpop.f32.mrb[1].mxu0 }
 0x114   : > { %433 = vst [vmem:[#allocation3 + $0x8] sm:$0xff] %v627_v5  ;;  %v423_v7 = vpop.f32.mrb[1].mxu1  ;;  %351 = vst [vmem:[#allocation2] sm:$0xff] %v342_v6 }
 0x115   : > { %432 = vst [vmem:[#allocation3] sm:$0xff] %v423_v7 }
 0x116 PF: > { %v434_v8 = vld [vmem:[%s959_s26] sm:$0xff]  ;;  %v435_v9 = vld [vmem:[%s959_s26 + $0x8] sm:$0xff]  ;;  %s611_s9 = sshll.u32 %s802_s18, 8  ;;  %s485_s11 = sshll.u32 %s965_s10, 4  ;;  %s990_s11 = int_to_ptr.vmem [resolvable:$true] %s485_s11 }
 0x117   : > { %436 = vadd.xlane.f32.xlu0 %v434_v8  ;;  %s988_s25 = scalar_lea.hbm %s1044_s4, %s611_s9  ;;  %s470_s26 = scalar_lea.sflag [#allocation6], %s955_s22 }
 0x118   : > { %s728_s12 = scalar_lea.vmem %s990_s11, 256  ;;  %p1052_p11 = scmp.ne.s32.totalorder %s1048_s28, 0 }
 0x119   : > { %p729_p8 = scmp.ne.s32.totalorder %s990_s11, %s728_s12  ;;  %s815_s18 = smov [#allocation7]  }
 0x11a   : > { %v460_v30 = vld [vmem:[#allocation2 + $0x8] sm:$0xff]  ;;  %s732_s13 = sshll.u32 %s815_s18, 4  ;;  %s733_s13 = int_to_ptr.vmem [resolvable:$false] %s732_s13 }
 0x11b   : > { %438 = vadd.xlane.f32.xlu0 %v435_v9  ;;  %v459_v25 = vld [vmem:[#allocation2] sm:$0xff]  ;;  %v464_v33 = vld [vmem:[#allocation3 + $0x8] sm:$0xff]  ;;  %p730_p0 = pnand %p729_p8, %p1052_p11  ;;  %s734_s14 = scalar_lea.vmem %s733_s13, 512 }
 0x11c   : > { %v463_v27 = vld [vmem:[#allocation3] sm:$0xff]  ;;  %p735_p13 = scmp.lt.s32.totalorder %s990_s11, %s733_s13  ;;  %p736_p2 = scmp.lt.s32.totalorder %s734_s14, %s728_s12 }
 0x11d   : > { %p731_p6 = pneg %p730_p0 }
 0x11e   : > { %p737_p5 = por %p736_p2, %p735_p13 }
 0x120   : > { %p738_p4 = pnand %p737_p5, %p731_p6 }
 0x1a4   : > { %v437_v10 = vpop.xlane.xlu0 %436 }
 0x1a5   : > { %v441_v11 = vmul.f32 0.0078125, %v437_v10 }
 0x1a7   : > { %v443_v12 = vsub.f32 %v434_v8, %v441_v11 }
 0x1a8   : > { %v439_v13 = vpop.xlane.xlu0 %438 }
 0x1a9   : > { %v442_v14 = vmul.f32 0.0078125, %v439_v13  ;;  %v445_v15 = vmul.f32 %v443_v12, %v443_v12 }
 0x1ab   : > { %v444_v16 = vsub.f32 %v435_v9, %v442_v14  ;;  %447 = vadd.xlane.f32.xlu1 %v445_v15 }
 0x1ad   : > { %v446_v17 = vmul.f32 %v444_v16, %v444_v16 }
 0x1af   : > { %449 = vadd.xlane.f32.xlu1 %v446_v17 }
 0x238   : > { %v448_v18 = vpop.xlane.xlu1 %447 }
 0x239   : > { %v451_v19 = vmul.f32 0.0078125, %v448_v18 }
 0x23b   : > { %v453_v20 = vadd.f32 1e-05, %v451_v19 }
 0x23c   : > { %v450_v21 = vpop.xlane.xlu1 %449 }
 0x23d   : > { %694 = vrsqrt.f32 %v453_v20  ;;  %v452_v22 = vmul.f32 0.0078125, %v450_v21 }
 0x23f   : > { %v454_v23 = vadd.f32 1e-05, %v452_v22 }
 0x241   : > { %696 = vrsqrt.f32 %v454_v23 }
 0x247   : > { %v695_v24 = vpop.eup %694 }
 0x248   : > { %v457_v26 = vmul.f32 %v695_v24, %v443_v12 }
 0x24a   : > { %v461_v28 = vmul.f32 %v459_v25, %v457_v26 }
 0x24b   : > { %v697_v29 = vpop.eup %696 }
 0x24c   : > { %v458_v31 = vmul.f32 %v697_v29, %v444_v16  ;;  %v465_v32 = vadd.f32 %v463_v27, %v461_v28 }
 0x24e   : > { %v462_v34 = vmul.f32 %v460_v30, %v458_v31  ;;  %467 = vst [vmem:[%s965_s10] sm:$0xff] %v465_v32 }
 0x250   : > { %v466_v35 = vadd.f32 %v464_v33, %v462_v34 }
 0x252   : > { %468 = vst [vmem:[%s965_s10 + $0x8] sm:$0xff] %v466_v35 }
 0x253   : > { %741 = shalt.err (!%p738_p4)
}
 0x254   : > { %s742_s10 = scalar_lea.hbm %s988_s25, 256  ;;  %s746_s7 = scalar_lea.hbm %s1044_s4, 512 }
 0x255   : > { %p743_p7 = scmp.ne.s32.totalorder %s988_s25, %s742_s10  ;;  %p747_p1 = scmp.lt.u32.totalorder %s988_s25, %s1044_s4 }
 0x256   : > { %p748_p3 = scmp.lt.u32.totalorder %s746_s7, %s742_s10  ;;  %p750_p8 = scmp.lt.u32.totalorder %s742_s10, %s988_s25 }
 0x257   : > { %p744_p10 = pnand %p743_p7, %p1052_p11 }
 0x258   : > { %p749_p9 = por %p748_p3, %p747_p1 }
 0x259   : > { %p745_p12 = pneg %p744_p10 }
 0x25a   : > { %p751_p0 = por %p750_p8, %p749_p9 }
 0x25c   : > { %p752_p6 = pnand %p751_p0, %p745_p12 }
 0x25e   : > { %755 = shalt.err (!%p752_p6)
}
 0x25f   : > { %s816_s9 = smov 128   ;;  %s817_s21 = smov 8  }
 0x260   : > { %630 = dma.vmem_to_hbm [thread:$0]  (%p1052_p11), %s990_s11, 256, %s988_s25, %s470_s26, %s816_s9, %s816_s9, %s817_s21  }
 0x261 PF: > { %s500_s24 = sand.u32 1, %s790_s15   ;;  %p1053_p13 = scmp.ne.s32.totalorder %s1049_s30, 0 }
 0x262   : > { %p1054_p2 = scmp.ge.s32.totalorder %s810_s20, 2  ;;  %s501_s12 = scalar_lea.sflag [#allocation6], %s500_s24 }
 0x264   : > { %p637_p5 = pnand %p1054_p2, %p1053_p13 }
 0x266   : > { %785 = dma.done.wait (!%p637_p5), %s501_s12, 256  }
 0x267   : > { %787 = vsyncadd (!%p637_p5), %s501_s12, 4294967040  ;;  %s20_s20 = sadd.s32 1, %s810_s20   ;;  %s1055_s15 = smov %s794_s16 }
 0x268   : > { %p17_p4 = scmp.ge.s32.totalorder %s20_s20, 4   ;;  %s1056_s16 = smov %s798_s17 }
 0x269   : > { %s1057_s17 = smov %s899_s29  ;;  %s1058_s18 = smov %s806_s19 }
 0x26a   : > { %s1059_s19 = smov %s1061_s23  ;;  %19 = sbr.rel (!%p17_p4) target bundleno = 6 (0x6), region = 88 }
 0x271   :  { %506 = vsyncpa [#allocation5], 1 }
 0x272   :  { %508 = vsyncpa [#allocation5 + $0x1], 1 }
 0x273   :  { %509 = vsyncpa [#allocation6], 1 }
 0x274   :  { %511 = vsyncpa [#allocation6 + $0x1], 1 }

</bundles_post_ra>
